<compile_context>
chip_gen: v5e
topology: v5e:2x2
jax: 0.10.0
libtpu: 0.0.40
codegen_flags: <defaults>
</compile_context>

<pallas_src>
import functools

import jax
import jax.numpy as jnp
from jax.experimental import pallas as pl
from jax.experimental.pallas import tpu as pltpu

LANE = 128     # lane grain (last dim)
SUBLANE = 8    # f32 sublane grain (second-to-last dim)


def _round_up(x: int, m: int) -> int:
    return ((x + m - 1) // m) * m


# ----------------------------------------------------------------------------
# One-time parameter preparation (hoisted out of the forward hot path).
# ----------------------------------------------------------------------------
def prepare_params(hidden_params, out_params, dtype=jnp.float32):
    """Transpose + zero-pad weights to (Kp, Np) with Kp/Np multiples of 128; bias/scale f32.

    Padding is exact zeros, so padded K rows contribute nothing to matmuls and padded N
    columns stay exactly zero through relu/scale (safe to feed into the next layer).
    """
    layers = []
    for (W, b, s) in hidden_params:
        N, K = W.shape
        Kp, Np = _round_up(K, LANE), _round_up(N, LANE)
        Wp = jnp.zeros((Kp, Np), dtype).at[:K, :N].set(W.T.astype(dtype))
        bp = jnp.zeros((1, Np), jnp.float32).at[:, :N].set(b.astype(jnp.float32)[None, :])
        sp = jnp.zeros((1, Np), jnp.float32).at[:, :N].set(s.astype(jnp.float32)[None, :])
        layers.append((Wp, bp, sp))
    Wo, bo = out_params
    No, Ko = Wo.shape
    Kop, Nop = _round_up(Ko, LANE), _round_up(No, LANE)
    Wop = jnp.zeros((Kop, Nop), dtype).at[:Ko, :No].set(Wo.T.astype(dtype))
    bop = jnp.zeros((1, Nop), jnp.float32).at[:, :No].set(bo.astype(jnp.float32)[None, :])
    in_dim = hidden_params[0][0].shape[1] if hidden_params else Ko
    return {"hidden": layers, "out": (Wop, bop), "in_dim": in_dim, "out_dim": No}


# ----------------------------------------------------------------------------
# Whole-network fused kernel (weights resident in VMEM, grid over batch tiles).
# ----------------------------------------------------------------------------
def _fullnet_kernel(*refs, n_hidden):
    x_ref, o_ref = refs[0], refs[-1]
    p = refs[1:-1]
    h = x_ref[...].astype(jnp.float32)
    for li in range(n_hidden):
        w = p[3 * li][...]
        b = p[3 * li + 1][...]
        s = p[3 * li + 2][...]
        h = jnp.maximum(jnp.dot(h, w, preferred_element_type=jnp.float32) + b, 0.0) * s
    wo, bo = p[3 * n_hidden][...], p[3 * n_hidden + 1][...]
    o_ref[...] = (jnp.dot(h, wo, preferred_element_type=jnp.float32) + bo).astype(o_ref.dtype)


def _forward_fullnet(x2d, prep, tb_max=256):
    B, Din = x2d.shape
    hidden = prep["hidden"]
    Wop, bop = prep["out"]
    Kp0 = hidden[0][0].shape[0] if hidden else Wop.shape[0]
    Nop = Wop.shape[1]

    tb = min(tb_max, _round_up(B, SUBLANE))
    Mp = _round_up(B, tb)
    xp = jnp.zeros((Mp, Kp0), jnp.float32).at[:B, :Din].set(x2d)

    operands = [xp]
    in_specs = [pl.BlockSpec((tb, Kp0), lambda i: (i, 0))]
    for (Wp, bp, sp) in hidden:
        for arr in (Wp, bp, sp):
            operands.append(arr)
            in_specs.append(pl.BlockSpec(arr.shape, lambda i: (0, 0)))   # resident in VMEM
    for arr in (Wop, bop):
        operands.append(arr)
        in_specs.append(pl.BlockSpec(arr.shape, lambda i: (0, 0)))

    param_bytes = sum(int(a.size) * a.dtype.itemsize for a in operands[1:])
    widths = [Kp0, Nop] + [w.shape[1] for (w, _, _) in hidden]
    act_bytes = tb * max(widths) * 4
    vmem_limit = int(min(48 * 1024 * 1024,
                         max(16 * 1024 * 1024, 2 * param_bytes + 12 * act_bytes)))

    out = pl.pallas_call(
        functools.partial(_fullnet_kernel, n_hidden=len(hidden)),
        out_shape=jax.ShapeDtypeStruct((Mp, Nop), jnp.float32),
        grid_spec=pltpu.PrefetchScalarGridSpec(
            num_scalar_prefetch=0,
            grid=(Mp // tb,),
            in_specs=in_specs,
            out_specs=pl.BlockSpec((tb, Nop), lambda i: (i, 0)),
        ),
        compiler_params=pltpu.CompilerParams(
            dimension_semantics=("parallel",),
            vmem_limit_bytes=vmem_limit,
        ),
    )(*operands)
    return out[:B, :prep["out_dim"]]


# ----------------------------------------------------------------------------
# Fallback: per-layer fused Linear(+ReLU+Scale) kernel for layers too big for
# the whole-net fusion. Accumulates directly into the f32 output block.
# ----------------------------------------------------------------------------
def _make_layer_kernel(apply_relu, apply_scale):
    def kernel(*refs):
        if apply_scale:
            x_ref, w_ref, b_ref, s_ref, o_ref = refs
        else:
            x_ref, w_ref, b_ref, o_ref = refs
            s_ref = None
        k = pl.program_id(2)

        @pl.when(k == 0)
        def _():
            o_ref[...] = jnp.zeros_like(o_ref)

        o_ref[...] += jnp.dot(x_ref[...], w_ref[...], preferred_element_type=jnp.float32)

        @pl.when(k == pl.num_programs(2) - 1)
        def _():
            y = o_ref[...] + b_ref[...]
            if apply_relu:
                y = jnp.maximum(y, 0.0)
            if apply_scale:
                y = y * s_ref[...]
            o_ref[...] = y

    return kernel


def _pick_tile(dim, cap):
    for t in (512, 256, 128):          # prefer 256+ lane width for v6e/v7x 256-wide MXU
        if t <= cap and dim % t == 0:
            return t
    return dim


def _fused_layer(h, Wp, bp, sp, *, apply_relu, apply_scale, tm, tn_max=512, tk_max=512):
    Mp, Kp = h.shape
    Kp2, Np = Wp.shape
    assert Kp2 == Kp
    tk = _pick_tile(Kp, tk_max)
    tn = _pick_tile(Np, tn_max)
    grid = (Mp // tm, Np // tn, Kp // tk)

    operands = [h, Wp, bp]
    in_specs = [
        pl.BlockSpec((tm, tk), lambda i, j, k: (i, k)),
        pl.BlockSpec((tk, tn), lambda i, j, k: (k, j)),
        pl.BlockSpec((1, tn), lambda i, j, k: (0, j)),
    ]
    if apply_scale:
        operands.append(sp)
        in_specs.append(pl.BlockSpec((1, tn), lambda i, j, k: (0, j)))

    return pl.pallas_call(
        _make_layer_kernel(apply_relu, apply_scale),
        out_shape=jax.ShapeDtypeStruct((Mp, Np), jnp.float32),
        grid_spec=pltpu.PrefetchScalarGridSpec(
            num_scalar_prefetch=0,
            grid=grid,
            in_specs=in_specs,
            out_specs=pl.BlockSpec((tm, tn), lambda i, j, k: (i, j)),
        ),
        compiler_params=pltpu.CompilerParams(
            dimension_semantics=("parallel", "parallel", "arbitrary"),
            vmem_limit_bytes=48 * 1024 * 1024,
        ),
    )(*operands)


# ----------------------------------------------------------------------------
# Forward pass.
# ----------------------------------------------------------------------------
def fc_network_forward(x, prep, *, fuse_vmem_budget=6 * 1024 * 1024):
    """Pallas forward of FullyConnectedNetwork (reg_type='scale-lasso')."""
    B = x.shape[0]
    h2d = x.reshape(B, -1).astype(jnp.float32)          # nn.Flatten (layout-only, wrapper)

    hidden = prep["hidden"]
    Wop, bop = prep["out"]
    param_bytes = sum(int(a.size) * a.dtype.itemsize
                      for lyr in hidden for a in lyr)
    param_bytes += int(Wop.size) * Wop.dtype.itemsize + int(bop.size) * bop.dtype.itemsize

    if param_bytes <= fuse_vmem_budget:
        # Small network: one kernel for the whole forward pass.
        return _forward_fullnet(h2d, prep)

    # Large network: per-layer fused kernels, activations carried padded; pad input once,
    # slice output once.
    Kp0 = hidden[0][0].shape[0] if hidden else Wop.shape[0]
    tm = min(256, _round_up(B, SUBLANE))
    Mp = _round_up(B, tm)
    hp = jnp.zeros((Mp, Kp0), jnp.float32).at[:B, :h2d.shape[1]].set(h2d)
    for (Wp, bp, sp) in hidden:
        hp = _fused_layer(hp, Wp, bp, sp, apply_relu=True, apply_scale=True, tm=tm)
    hp = _fused_layer(hp, Wop, bop, None, apply_relu=False, apply_scale=False, tm=tm)
    return hp[:B, :prep["out_dim"]]


def fc_network_ref(x, hidden_params, out_params):
    """Pure-JAX reference with identical semantics to the PyTorch module."""
    B = x.shape[0]
    h = x.reshape(B, -1)
    for (W_, b_, s_) in hidden_params:
        h = jnp.maximum(h @ W_.T + b_, 0.0) * s_
    W_o, b_o = out_params
    return h @ W_o.T + b_o


# TODO(synk): get_loss / lasso regularization terms are training-time only and not part of
# the module's forward pass; they are intentionally not implemented as kernels.

if __name__ == "__main__":
    key = jax.random.PRNGKey(0)
    keys = jax.random.split(key, 16)

    # Small shapes consistent with the module: image-like input, Flatten -> in_dim.
    batch, C, H, W = 2, 4, 8, 8
    in_dim = C * H * W                 # 256
    layers = [64, 32]
    out_dim = 10

    x = jax.random.normal(keys[0], (batch, C, H, W), dtype=jnp.float32)

    # Parameters (PyTorch Linear-style init ranges; scale uses non-trivial values to
    # exercise the fused epilogue — module init is ones).
    hidden_params = []
    last = in_dim
    ki = 1
    for width in layers:
        bound = 1.0 / (last ** 0.5)
        W_ = jax.random.uniform(keys[ki], (width, last), jnp.float32, -bound, bound); ki += 1
        b_ = jax.random.uniform(keys[ki], (width,), jnp.float32, -bound, bound); ki += 1
        s_ = 1.0 + 0.1 * jax.random.normal(keys[ki], (width,), dtype=jnp.float32); ki += 1
        hidden_params.append((W_, b_, s_))
        last = width
    bound = 1.0 / (last ** 0.5)
    W_out = jax.random.uniform(keys[ki], (out_dim, last), jnp.float32, -bound, bound); ki += 1
    b_out = jax.random.uniform(keys[ki], (out_dim,), jnp.float32, -bound, bound); ki += 1
    out_params = (W_out, b_out)

    # One-time parameter prep (transpose/pad hoisted out of the forward hot path).
    prep = prepare_params(hidden_params, out_params)
    prep = jax.tree_util.tree_map(jax.block_until_ready, prep)

    ref = fc_network_ref(x, hidden_params, out_params)

    # Fast path: whole network fused into a single pallas_call.
    out = fc_network_forward(x, prep)
    out = jax.block_until_ready(out)
    assert out.shape == (batch, out_dim)
    assert jnp.allclose(out, ref, atol=1e-4, rtol=1e-4), "fused whole-net mismatch vs reference"

    # Also exercise the per-layer fallback path (forced) and verify it agrees.
    out2 = fc_network_forward(x, prep, fuse_vmem_budget=0)
    out2 = jax.block_until_ready(out2)
    assert jnp.allclose(out2, ref, atol=1e-4, rtol=1e-4), "per-layer path mismatch vs reference"

    print("KERNEL_OK")
</pallas_src>

<mosaic_0001>
module attributes {stable_mosaic.version = 11 : i64} {
  func.func @_fullnet_kernel(%arg0: i32, %arg1: memref<8x256xf32, #tpu.memory_space<vmem>>, %arg2: memref<256x128xf32, #tpu.memory_space<vmem>>, %arg3: memref<1x128xf32, #tpu.memory_space<vmem>>, %arg4: memref<1x128xf32, #tpu.memory_space<vmem>>, %arg5: memref<128x128xf32, #tpu.memory_space<vmem>>, %arg6: memref<1x128xf32, #tpu.memory_space<vmem>>, %arg7: memref<1x128xf32, #tpu.memory_space<vmem>>, %arg8: memref<128x128xf32, #tpu.memory_space<vmem>>, %arg9: memref<1x128xf32, #tpu.memory_space<vmem>>, %arg10: memref<8x128xf32, #tpu.memory_space<vmem>>) attributes {dimension_semantics = [#tpu.dimension_semantics<parallel>], iteration_bounds = array<i64: 1>, scalar_prefetch = 0 : i64, scratch_operands = 0 : i64, tpu.core_type = #tpu.core_type<tc>, window_params = [{transform_indices = @transform_0, window_bounds = array<i64: 8, 256>}, {pipeline_mode = #tpu.pipeline_mode<synchronous>, transform_indices = @transform_1, window_bounds = array<i64: 256, 128>}, {pipeline_mode = #tpu.pipeline_mode<synchronous>, transform_indices = @transform_2, window_bounds = array<i64: 1, 128>}, {pipeline_mode = #tpu.pipeline_mode<synchronous>, transform_indices = @transform_3, window_bounds = array<i64: 1, 128>}, {pipeline_mode = #tpu.pipeline_mode<synchronous>, transform_indices = @transform_4, window_bounds = array<i64: 128, 128>}, {pipeline_mode = #tpu.pipeline_mode<synchronous>, transform_indices = @transform_5, window_bounds = array<i64: 1, 128>}, {pipeline_mode = #tpu.pipeline_mode<synchronous>, transform_indices = @transform_6, window_bounds = array<i64: 1, 128>}, {pipeline_mode = #tpu.pipeline_mode<synchronous>, transform_indices = @transform_7, window_bounds = array<i64: 128, 128>}, {pipeline_mode = #tpu.pipeline_mode<synchronous>, transform_indices = @transform_8, window_bounds = array<i64: 1, 128>}, {transform_indices = @transform_9, window_bounds = array<i64: 8, 128>}]} {
    %c0 = arith.constant 0 : index
    %c0_0 = arith.constant 0 : index
    %0 = vector.load %arg1[%c0, %c0_0] : memref<8x256xf32, #tpu.memory_space<vmem>>, vector<8x256xf32>
    %c0_1 = arith.constant 0 : index
    %c0_2 = arith.constant 0 : index
    %1 = vector.load %arg2[%c0_1, %c0_2] : memref<256x128xf32, #tpu.memory_space<vmem>>, vector<256x128xf32>
    %c0_3 = arith.constant 0 : index
    %c0_4 = arith.constant 0 : index
    %2 = vector.load %arg3[%c0_3, %c0_4] : memref<1x128xf32, #tpu.memory_space<vmem>>, vector<1x128xf32>
    %c0_5 = arith.constant 0 : index
    %c0_6 = arith.constant 0 : index
    %3 = vector.load %arg4[%c0_5, %c0_6] : memref<1x128xf32, #tpu.memory_space<vmem>>, vector<1x128xf32>
    %cst = arith.constant dense<0.000000e+00> : vector<8x128xf32>
    %4 = tpu.matmul %0, %1, %cst {dimension_numbers = #tpu.dot_dimension_numbers<[1], [0], [0], [1], [0, 0, 1, 1], [], []>} : vector<8x256xf32>, vector<256x128xf32>, vector<8x128xf32> -> vector<8x128xf32>
    %5 = vector.broadcast %2 : vector<1x128xf32> to vector<8x128xf32>
    %6 = arith.addf %4, %5 : vector<8x128xf32>
    %cst_7 = arith.constant 0.000000e+00 : f32
    %7 = vector.broadcast %cst_7 : f32 to vector<8x128xf32>
    %8 = arith.maximumf %6, %7 : vector<8x128xf32>
    %9 = vector.broadcast %3 : vector<1x128xf32> to vector<8x128xf32>
    %10 = arith.mulf %8, %9 : vector<8x128xf32>
    %c0_8 = arith.constant 0 : index
    %c0_9 = arith.constant 0 : index
    %11 = vector.load %arg5[%c0_8, %c0_9] : memref<128x128xf32, #tpu.memory_space<vmem>>, vector<128x128xf32>
    %c0_10 = arith.constant 0 : index
    %c0_11 = arith.constant 0 : index
    %12 = vector.load %arg6[%c0_10, %c0_11] : memref<1x128xf32, #tpu.memory_space<vmem>>, vector<1x128xf32>
    %c0_12 = arith.constant 0 : index
    %c0_13 = arith.constant 0 : index
    %13 = vector.load %arg7[%c0_12, %c0_13] : memref<1x128xf32, #tpu.memory_space<vmem>>, vector<1x128xf32>
    %cst_14 = arith.constant dense<0.000000e+00> : vector<8x128xf32>
    %14 = tpu.matmul %10, %11, %cst_14 {dimension_numbers = #tpu.dot_dimension_numbers<[1], [0], [0], [1], [0, 0, 1, 1], [], []>} : vector<8x128xf32>, vector<128x128xf32>, vector<8x128xf32> -> vector<8x128xf32>
    %15 = vector.broadcast %12 : vector<1x128xf32> to vector<8x128xf32>
    %16 = arith.addf %14, %15 : vector<8x128xf32>
    %cst_15 = arith.constant 0.000000e+00 : f32
    %17 = vector.broadcast %cst_15 : f32 to vector<8x128xf32>
    %18 = arith.maximumf %16, %17 : vector<8x128xf32>
    %19 = vector.broadcast %13 : vector<1x128xf32> to vector<8x128xf32>
    %20 = arith.mulf %18, %19 : vector<8x128xf32>
    %c0_16 = arith.constant 0 : index
    %c0_17 = arith.constant 0 : index
    %21 = vector.load %arg8[%c0_16, %c0_17] : memref<128x128xf32, #tpu.memory_space<vmem>>, vector<128x128xf32>
    %c0_18 = arith.constant 0 : index
    %c0_19 = arith.constant 0 : index
    %22 = vector.load %arg9[%c0_18, %c0_19] : memref<1x128xf32, #tpu.memory_space<vmem>>, vector<1x128xf32>
    %cst_20 = arith.constant dense<0.000000e+00> : vector<8x128xf32>
    %23 = tpu.matmul %20, %21, %cst_20 {dimension_numbers = #tpu.dot_dimension_numbers<[1], [0], [0], [1], [0, 0, 1, 1], [], []>} : vector<8x128xf32>, vector<128x128xf32>, vector<8x128xf32> -> vector<8x128xf32>
    %24 = vector.broadcast %22 : vector<1x128xf32> to vector<8x128xf32>
    %25 = arith.addf %23, %24 : vector<8x128xf32>
    %c0_21 = arith.constant 0 : index
    %c0_22 = arith.constant 0 : index
    %26 = vector.load %arg10[%c0_21, %c0_22] : memref<8x128xf32, #tpu.memory_space<vmem>>, vector<8x128xf32>
    tpu.vector_store %arg10[%c0_21, %c0_22], %25 {strides = array<i32>} : memref<8x128xf32, #tpu.memory_space<vmem>>, vector<8x128xf32>,
    return
  }
  func.func @transform_0(%arg0: i32) -> (i32, i32) {
    %c0_i32 = arith.constant 0 : i32
    %c0_i32_0 = arith.constant 0 : i32
    return %arg0, %c0_i32 : i32, i32
  }
  func.func @transform_1(%arg0: i32) -> (i32, i32) {
    %c0_i32 = arith.constant 0 : i32
    %c0_i32_0 = arith.constant 0 : i32
    %c0_i32_1 = arith.constant 0 : i32
    return %c0_i32, %c0_i32_0 : i32, i32
  }
  func.func @transform_2(%arg0: i32) -> (i32, i32) {
    %c0_i32 = arith.constant 0 : i32
    %c0_i32_0 = arith.constant 0 : i32
    %c0_i32_1 = arith.constant 0 : i32
    return %c0_i32, %c0_i32_0 : i32, i32
  }
  func.func @transform_3(%arg0: i32) -> (i32, i32) {
    %c0_i32 = arith.constant 0 : i32
    %c0_i32_0 = arith.constant 0 : i32
    %c0_i32_1 = arith.constant 0 : i32
    return %c0_i32, %c0_i32_0 : i32, i32
  }
  func.func @transform_4(%arg0: i32) -> (i32, i32) {
    %c0_i32 = arith.constant 0 : i32
    %c0_i32_0 = arith.constant 0 : i32
    %c0_i32_1 = arith.constant 0 : i32
    return %c0_i32, %c0_i32_0 : i32, i32
  }
  func.func @transform_5(%arg0: i32) -> (i32, i32) {
    %c0_i32 = arith.constant 0 : i32
    %c0_i32_0 = arith.constant 0 : i32
    %c0_i32_1 = arith.constant 0 : i32
    return %c0_i32, %c0_i32_0 : i32, i32
  }
  func.func @transform_6(%arg0: i32) -> (i32, i32) {
    %c0_i32 = arith.constant 0 : i32
    %c0_i32_0 = arith.constant 0 : i32
    %c0_i32_1 = arith.constant 0 : i32
    return %c0_i32, %c0_i32_0 : i32, i32
  }
  func.func @transform_7(%arg0: i32) -> (i32, i32) {
    %c0_i32 = arith.constant 0 : i32
    %c0_i32_0 = arith.constant 0 : i32
    %c0_i32_1 = arith.constant 0 : i32
    return %c0_i32, %c0_i32_0 : i32, i32
  }
  func.func @transform_8(%arg0: i32) -> (i32, i32) {
    %c0_i32 = arith.constant 0 : i32
    %c0_i32_0 = arith.constant 0 : i32
    %c0_i32_1 = arith.constant 0 : i32
    return %c0_i32, %c0_i32_0 : i32, i32
  }
  func.func @transform_9(%arg0: i32) -> (i32, i32) {
    %c0_i32 = arith.constant 0 : i32
    %c0_i32_0 = arith.constant 0 : i32
    return %arg0, %c0_i32 : i32, i32
  }
}

</mosaic_0001>

<bundles_post_ra>
// kernel: tpu_custom_call.1
= control target key start
LH: loop header
LB: loop body
LE: loop exit
PB: predicated region body
PF: predicated region fallthrough
CT: control target
= control target key end

     0   :  { %14 = vsyncpa [#allocation3], 0  ;;  %s511_s0 = inlined_call_operand.hbm [shape: f32[8,256], index: 0, kind: input, shape index: {}]   ;;  %s512_s1 = inlined_call_operand.hbm [shape: f32[256,128], index: 1, kind: input, shape index: {}]   ;;  %s513_s2 = inlined_call_operand.vmem [shape: f32[1,128], index: 2, kind: input, shape index: {}]   ;;  %s514_s3 = inlined_call_operand.vmem [shape: f32[1,128], index: 3, kind: input, shape index: {}]   ;;  %s515_s4 = inlined_call_operand.hbm [shape: f32[128,128], index: 4, kind: input, shape index: {}]   ;;  %s516_s5 = inlined_call_operand.vmem [shape: f32[1,128], index: 5, kind: input, shape index: {}]   ;;  %s517_s6 = inlined_call_operand.vmem [shape: f32[1,128], index: 6, kind: input, shape index: {}]   ;;  %s518_s7 = inlined_call_operand.hbm [shape: f32[128,128], index: 7, kind: input, shape index: {}]   ;;  %s519_s8 = inlined_call_operand.vmem [shape: f32[1,128], index: 8, kind: input, shape index: {}]   ;;  %s520_s9 = inlined_call_operand.hbm [shape: f32[8,128], index: 9, kind: output, shape index: {}]  }
   0x1   :  { %15 = vsyncpa [#allocation6], 0 }
   0x2   :  { %16 = vsyncpa [#allocation9], 0  ;;  %s33_s11 = sshll.u32 %s512_s1, 4  ;;  %s34_s11 = int_to_ptr.hbm [resolvable:$true] %s33_s11 }
   0x3   :  { %17 = vsyncpa [#allocation4], 0  ;;  %s424_s12 = smov [#allocation5]   ;;  %s23_s16 = sshll.u32 %s511_s0, 4  ;;  %s24_s16 = int_to_ptr.hbm [resolvable:$true] %s23_s16 }
   0x4   :  { %s35_s13 = sshll.u32 %s424_s12, 4  ;;  %s425_s17 = smov 128   ;;  %s36_s13 = int_to_ptr.vmem [resolvable:$true] %s35_s13 }
   0x5   :  { %s426_s18 = smov 8   ;;  %s427_s19 = smov [#allocation2]  }
   0x6   :  { %41 = dma.hbm_to_vmem [thread:$0]  %s34_s11, 4096, %s36_s13, [#allocation6], %s425_s17, %s425_s17, %s426_s18  }
   0x7   :  { %s25_s20 = sshll.u32 %s427_s19, 4  ;;  %s50_s23 = sshll.u32 %s515_s4, 4  ;;  %s26_s20 = int_to_ptr.vmem [resolvable:$true] %s25_s20  ;;  %s51_s23 = int_to_ptr.hbm [resolvable:$true] %s50_s23 }
   0x8   :  { %28 = dma.hbm_to_vmem [thread:$0]  %s24_s16, 256, %s26_s20, [#allocation3]  }
   0x9   :  { %s67_s25 = sshll.u32 %s518_s7, 4  ;;  %s428_s26 = smov [#allocation7]   ;;  %s68_s25 = int_to_ptr.hbm [resolvable:$true] %s67_s25 }
   0xa   :  { %s52_s27 = sshll.u32 %s428_s26, 4  ;;  %s429_s0 = smov [#allocation8]   ;;  %s53_s27 = int_to_ptr.vmem [resolvable:$true] %s52_s27 }
   0xb   :  { %58 = dma.hbm_to_vmem [thread:$0]  %s51_s23, 2048, %s53_s27, [#allocation6], %s425_s17, %s425_s17, %s426_s18  }
   0xc   :  { %s69_s28 = sshll.u32 %s429_s0, 4  ;;  %s70_s28 = int_to_ptr.vmem [resolvable:$true] %s69_s28 }
   0xd   :  { %75 = dma.hbm_to_vmem [thread:$0]  %s68_s25, 2048, %s70_s28, [#allocation9], %s425_s17, %s425_s17, %s426_s18  }
   0xe   :  { %416 = dma.done.wait [#allocation3], 256  }
   0xf   :  { %417 = vsyncadd [#allocation3], 4294967040 }
  0x10   :  { %418 = dma.done.wait [#allocation6], 6144  }
  0x11   :  { %419 = vsyncadd [#allocation6], 4294961152 }
  0x12   :  { %420 = dma.done.wait [#allocation9], 2048  }
  0x13   :  { %421 = vsyncadd [#allocation9], 4294965248  ;;  %v111_v0 = vld [vmem:[#allocation5 + $0x78] sm:$0xff]  ;;  %v110_v1 = vld [vmem:[#allocation5 + $0x70] sm:$0xff]  ;;  %s430_s14 = smov [#allocation10]   ;;  %s272_s18 = sshll.u32 %s520_s9, 4  ;;  %s273_s18 = int_to_ptr.hbm [resolvable:$true] %s272_s18 }
  0x14   :  { %v127_v2 = vld [vmem:[#allocation5 + $0xf8] sm:$0xff]  ;;  %133 = vmatpush.msra.mxu0 %v111_v0  ;;  %v126_v3 = vld [vmem:[#allocation5 + $0xf0] sm:$0xff]  ;;  %v109_v4 = vld [vmem:[#allocation5 + $0x68] sm:$0xff]  ;;  %s270_s15 = sshll.u32 %s430_s14, 4  ;;  %s271_s15 = int_to_ptr.vmem [resolvable:$true] %s270_s15 }
  0x15   :  { %153 = vmatpush.msra.mxu1 %v127_v2  ;;  %v125_v5 = vld [vmem:[#allocation5 + $0xe8] sm:$0xff]  ;;  %v108_v6 = vld [vmem:[#allocation5 + $0x60] sm:$0xff]  ;;  %v107_v8 = vld [vmem:[#allocation5 + $0x58] sm:$0xff] }
  0x16   :  { %134 = vmatpush.msra.mxu0 %v110_v1  ;;  %v124_v7 = vld [vmem:[#allocation5 + $0xe0] sm:$0xff]  ;;  %v123_v9 = vld [vmem:[#allocation5 + $0xd8] sm:$0xff]  ;;  %v106_v10 = vld [vmem:[#allocation5 + $0x50] sm:$0xff] }
  0x17   :  { %154 = vmatpush.msra.mxu1 %v126_v3  ;;  %v122_v11 = vld [vmem:[#allocation5 + $0xd0] sm:$0xff]  ;;  %v105_v12 = vld [vmem:[#allocation5 + $0x48] sm:$0xff]  ;;  %v193_v14 = vld [vmem:[#allocation7 + $0x78] sm:$0xff] }
  0x18   :  { %135 = vmatpush.msra.mxu0 %v109_v4  ;;  %v121_v13 = vld [vmem:[#allocation5 + $0xc8] sm:$0xff]  ;;  %v192_v15 = vld [vmem:[#allocation7 + $0x70] sm:$0xff]  ;;  %v104_v16 = vld [vmem:[#allocation5 + $0x40] sm:$0xff]  ;;  %199 = vmatpush.msra.mxu2 %v193_v14 }
  0x19   :  { %155 = vmatpush.msra.mxu1 %v125_v5  ;;  %v120_v17 = vld [vmem:[#allocation5 + $0xc0] sm:$0xff]  ;;  %v103_v18 = vld [vmem:[#allocation5 + $0x38] sm:$0xff]  ;;  %v191_v19 = vld [vmem:[#allocation7 + $0x68] sm:$0xff] }
  0x1a   :  { %136 = vmatpush.msra.mxu0 %v108_v6  ;;  %v102_v20 = vld [vmem:[#allocation5 + $0x30] sm:$0xff]  ;;  %v119_v21 = vld [vmem:[#allocation5 + $0xb8] sm:$0xff]  ;;  %200 = vmatpush.msra.mxu2 %v192_v15  ;;  %v190_v23 = vld [vmem:[#allocation7 + $0x60] sm:$0xff] }
  0x1b   :  { %156 = vmatpush.msra.mxu1 %v124_v7  ;;  %v118_v22 = vld [vmem:[#allocation5 + $0xb0] sm:$0xff]  ;;  %v189_v24 = vld [vmem:[#allocation7 + $0x58] sm:$0xff]  ;;  %v101_v25 = vld [vmem:[#allocation5 + $0x28] sm:$0xff] }
  0x1c   :  { %137 = vmatpush.msra.mxu0 %v107_v8  ;;  %201 = vmatpush.msra.mxu2 %v191_v19  ;;  %v117_v26 = vld [vmem:[#allocation5 + $0xa8] sm:$0xff]  ;;  %v188_v27 = vld [vmem:[#allocation7 + $0x50] sm:$0xff]  ;;  %v100_v28 = vld [vmem:[#allocation5 + $0x20] sm:$0xff] }
  0x1d   :  { %157 = vmatpush.msra.mxu1 %v123_v9  ;;  %v116_v29 = vld [vmem:[#allocation5 + $0xa0] sm:$0xff]  ;;  %v187_v30 = vld [vmem:[#allocation7 + $0x48] sm:$0xff]  ;;  %v99_v31 = vld [vmem:[#allocation5 + $0x18] sm:$0xff] }
  0x1e   :  { %138 = vmatpush.msra.mxu0 %v106_v10  ;;  %202 = vmatpush.msra.mxu2 %v190_v23  ;;  %v115_v32 = vld [vmem:[#allocation5 + $0x98] sm:$0xff]  ;;  %v186_v33 = vld [vmem:[#allocation7 + $0x40] sm:$0xff]  ;;  %v98_v34 = vld [vmem:[#allocation5 + $0x10] sm:$0xff] }
  0x1f   :  { %158 = vmatpush.msra.mxu1 %v122_v11  ;;  %v114_v35 = vld [vmem:[#allocation5 + $0x90] sm:$0xff]  ;;  %v185_v36 = vld [vmem:[#allocation7 + $0x38] sm:$0xff]  ;;  %v97_v37 = vld [vmem:[#allocation5 + $0x8] sm:$0xff] }
  0x20   :  { %139 = vmatpush.msra.mxu0 %v105_v12  ;;  %203 = vmatpush.msra.mxu2 %v189_v24  ;;  %v113_v38 = vld [vmem:[#allocation5 + $0x88] sm:$0xff]  ;;  %v184_v39 = vld [vmem:[#allocation7 + $0x30] sm:$0xff]  ;;  %v96_v40 = vld [vmem:[#allocation5] sm:$0xff] }
  0x21   :  { %159 = vmatpush.msra.mxu1 %v121_v13  ;;  %v112_v41 = vld [vmem:[#allocation5 + $0x80] sm:$0xff]  ;;  %v94_v42 = vld [vmem:[#allocation2] sm:$0xff]  ;;  %v95_v43 = vld [vmem:[#allocation2 + $0x8] sm:$0xff] }
  0x22   :  { %140 = vmatpush.msra.mxu0 %v104_v16  ;;  %204 = vmatpush.msra.mxu2 %v188_v27  ;;  %v183_v44 = vld [vmem:[#allocation7 + $0x28] sm:$0xff]  ;;  %v182_v45 = vld [vmem:[#allocation7 + $0x20] sm:$0xff]  ;;  %v181_v46 = vld [vmem:[#allocation7 + $0x18] sm:$0xff] }
  0x23   :  { %160 = vmatpush.msra.mxu1 %v120_v17  ;;  %v180_v47 = vld [vmem:[#allocation7 + $0x10] sm:$0xff]  ;;  %v179_v48 = vld [vmem:[#allocation7 + $0x8] sm:$0xff]  ;;  %v178_v49 = vld [vmem:[#allocation7] sm:$0xff] }
  0x24   :  { %141 = vmatpush.msra.mxu0 %v103_v18  ;;  %205 = vmatpush.msra.mxu2 %v187_v30  ;;  %v239_v50 = vld [vmem:[#allocation8 + $0x78] sm:$0xff]  ;;  %v238_v51 = vld [vmem:[#allocation8 + $0x70] sm:$0xff]  ;;  %v237_v52 = vld [vmem:[#allocation8 + $0x68] sm:$0xff] }
  0x25   :  { %161 = vmatpush.msra.mxu1 %v119_v21  ;;  %244 = vmatpush.msra.mxu3 %v239_v50  ;;  %v236_v53 = vld [vmem:[#allocation8 + $0x60] sm:$0xff]  ;;  %v235_v54 = vld [vmem:[#allocation8 + $0x58] sm:$0xff]  ;;  %v234_v55 = vld [vmem:[#allocation8 + $0x50] sm:$0xff] }
  0x26   :  { %142 = vmatpush.msra.mxu0 %v102_v20  ;;  %206 = vmatpush.msra.mxu2 %v186_v33  ;;  %v233_v56 = vld [vmem:[#allocation8 + $0x48] sm:$0xff]  ;;  %v232_v57 = vld [vmem:[#allocation8 + $0x40] sm:$0xff]  ;;  %v231_v58 = vld [vmem:[#allocation8 + $0x38] sm:$0xff] }
  0x27   :  { %162 = vmatpush.msra.mxu1 %v118_v22  ;;  %245 = vmatpush.msra.mxu3 %v238_v51  ;;  %v230_v59 = vld [vmem:[#allocation8 + $0x30] sm:$0xff]  ;;  %v229_v60 = vld [vmem:[#allocation8 + $0x28] sm:$0xff]  ;;  %v228_v62 = vld [vmem:[#allocation8 + $0x20] sm:$0xff] }
  0x28   :  { %143 = vmatpush.msra.mxu0 %v101_v25  ;;  %207 = vmatpush.msra.mxu2 %v185_v36  ;;  %v291_v61 = vld [vmem:[%s513_s2] ss:$0 sm:$0xff]  ;;  %v227_v6 = vld [vmem:[#allocation8 + $0x18] sm:$0xff]  ;;  %v225_v8 = vld [vmem:[#allocation8 + $0x8] sm:$0xff] }
  0x29   :  { %163 = vmatpush.msra.mxu1 %v117_v26  ;;  %246 = vmatpush.msra.mxu3 %v237_v52  ;;  %v292_v3 = vld [vmem:[%s514_s3] ss:$0 sm:$0xff]  ;;  %v224_v9 = vld [vmem:[#allocation8] sm:$0xff] }
  0x2a   :  { %144 = vmatpush.msra.mxu0 %v100_v28  ;;  %208 = vmatpush.msra.mxu2 %v184_v39  ;;  %v226_v7 = vld [vmem:[#allocation8 + $0x10] sm:$0xff] }
  0x2b   :  { %164 = vmatpush.msra.mxu1 %v116_v29  ;;  %247 = vmatpush.msra.mxu3 %v236_v53  ;;  %v293_v10 = vld [vmem:[%s516_s5] ss:$0 sm:$0xff] }
  0x2c   :  { %145 = vmatpush.msra.mxu0 %v99_v31  ;;  %209 = vmatpush.msra.mxu2 %v183_v44  ;;  %v294_v13 = vld [vmem:[%s517_s6] ss:$0 sm:$0xff] }
  0x2d   :  { %165 = vmatpush.msra.mxu1 %v115_v32  ;;  %248 = vmatpush.msra.mxu3 %v235_v54  ;;  %v295_v16 = vld [vmem:[%s519_s8] ss:$0 sm:$0xff] }
  0x2e   :  { %146 = vmatpush.msra.mxu0 %v98_v34  ;;  %210 = vmatpush.msra.mxu2 %v182_v45 }
  0x2f   :  { %166 = vmatpush.msra.mxu1 %v114_v35  ;;  %249 = vmatpush.msra.mxu3 %v234_v55 }
  0x30   :  { %147 = vmatpush.msra.mxu0 %v97_v37  ;;  %211 = vmatpush.msra.mxu2 %v181_v46 }
  0x31   :  { %167 = vmatpush.msra.mxu1 %v113_v38  ;;  %250 = vmatpush.msra.mxu3 %v233_v56 }
  0x32   :  { %148 = vmatpush.msra.mxu0 %v96_v40  ;;  %212 = vmatpush.msra.mxu2 %v180_v47 }
  0x33   :  { %168 = vmatpush.msra.mxu1 %v112_v41  ;;  %149 = vmatmul.f32.vlgmr.msra.gmra.mxu0 %v94_v42 }
  0x34   :  { %169 = vmatmul.f32.vlgmr.msra.gmra.mxu1 %v95_v43  ;;  %213 = vmatpush.msra.mxu2 %v179_v48 }
  0x35   :  { %251 = vmatpush.msra.mxu3 %v232_v57 }
  0x36   :  { %214 = vmatpush.msra.mxu2 %v178_v49 }
  0x37   :  { %252 = vmatpush.msra.mxu3 %v231_v58 }
  0x39   :  { %253 = vmatpush.msra.mxu3 %v230_v59 }
  0x3b   :  { %254 = vmatpush.msra.mxu3 %v229_v60 }
  0x3d   :  { %255 = vmatpush.msra.mxu3 %v228_v62 }
  0x3f   :  { %256 = vmatpush.msra.mxu3 %v227_v6 }
  0x41   :  { %257 = vmatpush.msra.mxu3 %v226_v7 }
  0x43   :  { %258 = vmatpush.msra.mxu3 %v225_v8 }
  0x45   :  { %259 = vmatpush.msra.mxu3 %v224_v9 }
  0xb0   :  { %v150_v63 = vpop.f32.mrf.mxu0 }
  0xb1   :  { %v170_v0 = vpop.f32.mrf.mxu1  ;;  %v151_v1 = vadd.f32 %v291_v61, %v150_v63 }
  0xb3   :  { %v171_v2 = vadd.f32 %v170_v0, %v151_v1 }
  0xb5   :  { %v173_v4 = vmax.f32 %v171_v2, 0.0 }
  0xb7   :  { %v177_v5 = vmul.f32 %v292_v3, %v173_v4 }
  0xb9   :  { %215 = vmatmul.f32.vlgmr.msra.gmra.mxu2 %v177_v5 }
 0x13c   :  { %v216_v11 = vpop.f32.mrf.mxu2 }
 0x13d   :  { %v217_v12 = vadd.f32 %v293_v10, %v216_v11 }
 0x13f   :  { %v219_v14 = vmax.f32 %v217_v12, 0.0 }
 0x141   :  { %v223_v15 = vmul.f32 %v294_v13, %v219_v14 }
 0x143   :  { %260 = vmatmul.f32.vlgmr.msra.gmra.mxu3 %v223_v15 }
 0x1c6   :  { %v261_v17 = vpop.f32.mrf.mxu3 }
 0x1c7   :  { %v262_v18 = vadd.f32 %v295_v16, %v261_v17 }
 0x1c9   :  { %264 = vst [vmem:[#allocation10] sm:$0xff] %v262_v18 }
 0x1ca   :  { %275 = dma.vmem_to_hbm [thread:$0]  %s271_s15, 128, %s273_s18, [#allocation4]  }
 0x1cb   :  { %422 = dma.done.wait [#allocation4], 128  }
 0x1cc   :  { %423 = vsyncadd [#allocation4], 4294967168 }
 0x1cd   :  { %280 = vsyncpa [#allocation3], 1 }
 0x1ce   :  { %281 = vsyncpa [#allocation6], 1 }
 0x1cf   :  { %282 = vsyncpa [#allocation9], 1 }
 0x1d0   :  { %283 = vsyncpa [#allocation4], 1 }

</bundles_post_ra>
